<compile_context>
chip_gen: v7x
topology: tpu7x:2x2x1
jax: 0.10.0
libtpu: 0.0.40
codegen_flags: <defaults>
</compile_context>

<pallas_src>
import functools

import jax
import jax.numpy as jnp
from jax.experimental import pallas as pl
from jax.experimental.pallas import tpu as pltpu

NEG_SLOPE = 0.2
NEG_INF = -1e30


# ---------------------------------------------------------------------------
# Kernel 1: node projection (grid over node tiles; runs once over all nodes).
# ---------------------------------------------------------------------------
def proj_kernel(x_ref, w_ref, a_ref, b_ref, feat_ref, res_ref, el_ref, er_ref):
    hf = feat_ref.shape[-1]
    h = el_ref.shape[-1]
    # fc + residual projections fused into one 2*HF-wide MXU matmul.
    proj = jnp.dot(x_ref[...], w_ref[...], preferred_element_type=jnp.float32)
    feat32 = proj[:, :hf]                                    # (Tn, HF)
    res_ref[...] = (proj[:, hf:] + b_ref[...]).astype(res_ref.dtype)
    feat_lo = feat32.astype(feat_ref.dtype)                  # aggregation dtype, cast once
    feat_ref[...] = feat_lo
    # el/er for all heads via one small matmul against the block matrix
    # [A_l | A_r] (MXU, not per-head VPU reductions).
    elr = jnp.dot(feat_lo.astype(a_ref.dtype), a_ref[...],
                  preferred_element_type=jnp.float32)        # (Tn, 2H)
    el_ref[...] = elr[:, :h]
    er_ref[...] = elr[:, h:]


# ---------------------------------------------------------------------------
# Kernel 2: masked edge softmax + aggregation (grid over destination tiles).
# ---------------------------------------------------------------------------
def gat_kernel(feat_ref, elt_ref, er_ref, res_ref, adjt_ref, out_ref, *,
               mxu_dtype, softmax_dtype):
    tv, hf_pad = out_ref.shape
    hf = res_ref.shape[-1]
    h = er_ref.shape[-1]
    f = hf // h

    feat = feat_ref[...]                          # (Np, HF)  aggregation dtype
    mask = adjt_ref[...] > 0                      # (Tv, Np)  int8 adjacency -> bool
    elt = elt_ref[...].astype(softmax_dtype)      # (H, Np)
    er = er_ref[...].astype(softmax_dtype)        # (Tv, H)
    res = res_ref[...]                            # (Tv, HF)  f32

    neg_inf = jnp.asarray(NEG_INF, dtype=softmax_dtype)
    slope = jnp.asarray(NEG_SLOPE, dtype=softmax_dtype)

    head_out = []
    for hh in range(h):                           # H is small & static -> unrolled
        # e[v, u] = leaky_relu(el[u] + er[v])
        e = er[:, hh:hh + 1] + elt[hh:hh + 1, :]                       # (Tv, Np)
        e = jnp.where(e > 0, e, slope * e)
        masked = jnp.where(mask, e, neg_inf)
        # edge_softmax over incoming edges u (lane-axis reduce).  Non-edges
        # (and padded source columns) get exp(NEG_INF - m) == 0 exactly, so
        # no `* adj` multiply is needed (binary adjacency assumed).
        m = jnp.max(masked, axis=-1, keepdims=True)                    # (Tv, 1)
        p = jnp.exp(masked - m)                                        # (Tv, Np)
        denom = jnp.sum(p, axis=-1, keepdims=True, dtype=jnp.float32)  # f32 accumulate
        denom = jnp.maximum(denom, 1e-20)         # zero-in-degree guard (no NaN)
        inv = pl.reciprocal(denom, approx=True)   # EUP slot
        inv = inv * (2.0 - denom * inv)           # one Newton step -> ~f32 accuracy
        alpha = p * inv.astype(softmax_dtype)                          # (Tv, Np)
        # message passing: rst[v, f] = sum_u alpha[v, u] * feat[u, h, f]
        head_out.append(
            jnp.dot(alpha.astype(mxu_dtype), feat[:, hh * f:(hh + 1) * f],
                    preferred_element_type=jnp.float32))               # (Tv, F)

    out = jnp.concatenate(head_out, axis=-1) + res                     # (Tv, HF)
    if hf_pad > hf:   # pad to >= 128 lanes so the store is an unmasked vst
        out = jnp.concatenate(
            [out, jnp.zeros((tv, hf_pad - hf), out.dtype)], axis=-1)
    out_ref[...] = out.astype(out_ref.dtype)


# ---------------------------------------------------------------------------
# Helpers
# ---------------------------------------------------------------------------
def _attn_block_matrix(attn):
    """(H, F) attention vector -> (H*F, H) block matrix so feat @ A equals the
    per-head reduction sum_f feat[:, h, f] * attn[h, f]."""
    h, f = attn.shape
    eye = jnp.eye(h, dtype=attn.dtype)
    return (attn[:, :, None] * eye[:, None, :]).reshape(h * f, h)


def _round_up(x, m):
    return (x + m - 1) // m * m


def _tpu_vmem_capacity_bytes():
    try:
        return int(pltpu.get_tpu_info().vmem_capacity_bytes)
    except Exception:           # query unavailable -> conservative 128 MiB assumption
        return 128 * 1024 * 1024


def _const_spec(shape, single_buffer):
    """BlockSpec for a grid-invariant input; single-buffered when supported."""
    ndim = len(shape)
    index_map = lambda j: (0,) * ndim
    if single_buffer:
        return pl.BlockSpec(shape, index_map, pipeline_mode=pl.Buffered(1))
    return pl.BlockSpec(shape, index_map)


# ---------------------------------------------------------------------------
# Wrapper
# ---------------------------------------------------------------------------
def gat_conv_pallas(x, adj, w_fc, attn_l, attn_r, w_res, b_res, *,
                    mxu_dtype=jnp.float32, softmax_dtype=None,
                    max_dst_tile=None, vmem_limit_bytes=None):
    """x: [N, Din], adj: [N, N] binary with adj[u, v] = edge u -> v.
    w_fc / w_res: [H*F, Din] (torch Linear.weight layout), attn_l/attn_r: [H, F],
    b_res: [H*F].  Returns [N, H, F] float32."""
    n, din = x.shape
    num_heads, f = attn_l.shape
    hf = num_heads * f

    if softmax_dtype is None:
        # bf16 softmax chain only when bf16 MXU operands are requested
        # (pass softmax_dtype=jnp.float32 explicitly on v5e: no bf16 VPU/EUP).
        softmax_dtype = (jnp.bfloat16
                         if jnp.dtype(mxu_dtype) == jnp.dtype(jnp.bfloat16)
                         else jnp.float32)

    cap = _tpu_vmem_capacity_bytes()
    if vmem_limit_bytes is None:
        vmem_limit_bytes = min(cap * 3 // 4, 100 * 1024 * 1024)  # ~48 MiB v7x, ~96 MiB v5e/v6e
    if max_dst_tile is None:
        max_dst_tile = 512 if cap >= 96 * 1024 * 1024 else 128

    # Node axis padded to a dst-tile multiple (multiple of 32 so the int8
    # adjacency tile keeps a native sublane layout).  Padded rows/columns are
    # inert (masked out of the softmax) and stripped at the end.
    tv = _round_up(min(int(max_dst_tile), _round_up(n, 32)), 32)
    n_pad = _round_up(n, tv)
    grid = (n_pad // tv,)
    hf_pad = hf if hf >= 128 else 128            # lane-dense output slab

    # ---- pre-packed, pre-transposed parameters (wrapper side, once) ------
    w_all = jnp.concatenate([w_fc.T, w_res.T], axis=1).astype(mxu_dtype)   # (Din, 2HF)
    a_lr = jnp.concatenate([_attn_block_matrix(attn_l),
                            _attn_block_matrix(attn_r)],
                           axis=1).astype(mxu_dtype)                       # (HF, 2H)
    b_row = b_res.reshape(1, hf).astype(jnp.float32)
    x_p = jnp.pad(x, ((0, n_pad - n), (0, 0))).astype(mxu_dtype)           # (Np, Din)
    # dst-major int8 adjacency: softmax reduces along lanes, 4x less HBM DMA.
    # TODO(synk): binary adjacency only; DGL edge_weight semantics not implemented.
    adj_t = jnp.pad((adj > 0).astype(jnp.int8).T,
                    ((0, n_pad - n), (0, n_pad - n)))                      # (Np, Np)

    params = pltpu.CompilerParams(
        dimension_semantics=("parallel",),       # node / dst tiles independent (megacore)
        vmem_limit_bytes=int(vmem_limit_bytes),
    )

    def _run(single_buffer):
        # -- pass 1: projection / residual / el / er (once over all nodes) --
        feat, res, el, er = pl.pallas_call(
            proj_kernel,
            out_shape=(jax.ShapeDtypeStruct((n_pad, hf), mxu_dtype),
                       jax.ShapeDtypeStruct((n_pad, hf), jnp.float32),
                       jax.ShapeDtypeStruct((n_pad, num_heads), jnp.float32),
                       jax.ShapeDtypeStruct((n_pad, num_heads), jnp.float32)),
            grid_spec=pltpu.PrefetchScalarGridSpec(
                num_scalar_prefetch=0,
                grid=grid,
                in_specs=[
                    pl.BlockSpec((tv, din), lambda j: (j, 0)),         # x tile
                    _const_spec((din, 2 * hf), single_buffer),         # [W_fc^T | W_res^T]
                    _const_spec((hf, 2 * num_heads), single_buffer),   # [A_l | A_r]
                    _const_spec((1, hf), single_buffer),               # residual bias
                ],
                out_specs=[
                    pl.BlockSpec((tv, hf), lambda j: (j, 0)),
                    pl.BlockSpec((tv, hf), lambda j: (j, 0)),
                    pl.BlockSpec((tv, num_heads), lambda j: (j, 0)),
                    pl.BlockSpec((tv, num_heads), lambda j: (j, 0)),
                ]),
            compiler_params=params,
        )(x_p, w_all, a_lr, b_row)

        # tiny (Np, H) -> (H, Np) transpose in the wrapper: avoids an XLU
        # transpose inside every dst tile.
        elt = el.T

        # -- pass 2: masked edge softmax + aggregation over dst tiles -------
        kernel = functools.partial(gat_kernel, mxu_dtype=mxu_dtype,
                                   softmax_dtype=softmax_dtype)
        out_pad = pl.pallas_call(
            kernel,
            out_shape=jax.ShapeDtypeStruct((n_pad, hf_pad), jnp.float32),
            grid_spec=pltpu.PrefetchScalarGridSpec(
                num_scalar_prefetch=0,
                grid=grid,
                in_specs=[
                    _const_spec((n_pad, hf), single_buffer),           # feat (all sources)
                    _const_spec((num_heads, n_pad), single_buffer),    # el^T (all sources)
                    pl.BlockSpec((tv, num_heads), lambda j: (j, 0)),   # er tile
                    pl.BlockSpec((tv, hf), lambda j: (j, 0)),          # residual tile
                    pl.BlockSpec((tv, n_pad), lambda j: (j, 0)),       # adj^T tile (int8)
                ],
                out_specs=pl.BlockSpec((tv, hf_pad), lambda j: (j, 0))),
            compiler_params=params,
        )(feat, elt, er, res, adj_t)
        return out_pad

    try:
        out_pad = _run(single_buffer=True)
    except Exception:
        # pipeline_mode=pl.Buffered(1) unsupported by this Pallas build ->
        # fall back to default double-buffering for the resident inputs.
        out_pad = _run(single_buffer=False)

    # strip node / lane padding; (N, HF) -> (N, H, F) is a pure reshape.
    return out_pad[:n, :hf].reshape(n, num_heads, f)


# ---------------------------------------------------------------------------
# Pure-JAX reference mirroring the PyTorch/DGL forward
# ---------------------------------------------------------------------------
def reference_gat(x, adj, w_fc, attn_l, attn_r, w_res, b_res):
    n, din = x.shape
    num_heads, f = attn_l.shape
    feat = (x @ w_fc.T).reshape(n, num_heads, f)
    el = jnp.sum(feat * attn_l[None], axis=-1)                  # (N, H)
    er = jnp.sum(feat * attn_r[None], axis=-1)                  # (N, H)
    e = el[:, None, :] + er[None, :, :]                         # (u, v, H)
    e = jnp.where(e > 0, e, NEG_SLOPE * e)
    mask = adj[:, :, None] > 0
    masked = jnp.where(mask, e, NEG_INF)
    m = jnp.max(masked, axis=0, keepdims=True)
    p = jnp.exp(masked - m) * adj[:, :, None]
    alpha = p / jnp.sum(p, axis=0, keepdims=True)               # (u, v, H)
    rst = jnp.einsum("uvh,uhf->vhf", alpha, feat)               # (N, H, F)
    res = (x @ w_res.T + b_res).reshape(n, num_heads, f)
    return rst + res


def xavier_normal(key, shape, gain):
    fan_out, fan_in = shape[0], shape[1]
    std = gain * (2.0 / (fan_in + fan_out)) ** 0.5
    return std * jax.random.normal(key, shape, dtype=jnp.float32)


if __name__ == "__main__":
    gain = 2.0 ** 0.5                      # calculate_gain('relu')

    def make_case(key, n, din, h, f, p_edge):
        k_x, k_adj, k_fc, k_al, k_ar, k_res = jax.random.split(key, 6)
        x = jax.random.normal(k_x, (n, din), dtype=jnp.float32)
        # random directed graph + self loops (module contract: no 0-in-degree)
        adj = (jax.random.uniform(k_adj, (n, n)) < p_edge).astype(jnp.float32)
        adj = jnp.maximum(adj, jnp.eye(n, dtype=jnp.float32))   # adj[u, v]: u -> v
        w_fc = xavier_normal(k_fc, (h * f, din), gain)          # fc.weight
        attn_l = xavier_normal(k_al, (h, f), gain)              # attn_l (1,H,F) squeezed
        attn_r = xavier_normal(k_ar, (h, f), gain)
        w_res = xavier_normal(k_res, (h * f, din), gain)        # res_fc.weight
        b_res = jnp.zeros((h * f,), dtype=jnp.float32)          # res_fc.bias init 0
        return x, adj, w_fc, attn_l, attn_r, w_res, b_res

    k1, k2 = jax.random.split(jax.random.PRNGKey(0))

    # TODO(synk): only the linear-residual branch (in_feats != H*F), eval-mode
    # dropout, edge_weight=None and get_attention=False paths are implemented.

    # Case 1: 16 nodes, in_feats=8, num_heads=4, out_feats=8 (single dst tile).
    args1 = make_case(k1, 16, 8, 4, 8, 0.3)
    ref1 = reference_gat(*args1)
    out1 = jax.block_until_ready(gat_conv_pallas(*args1))               # f32 operands
    assert out1.shape == (16, 4, 8)
    assert jnp.allclose(out1, ref1, atol=2e-3, rtol=2e-3), "case1 f32 mismatch"

    # bf16 MXU operands + bf16 softmax chain (v6e/v7x path), f32 accumulation.
    out1_bf16 = jax.block_until_ready(
        gat_conv_pallas(*args1, mxu_dtype=jnp.bfloat16))
    assert jnp.allclose(out1_bf16, ref1, atol=1e-1, rtol=1e-1), "case1 bf16 mismatch"

    # Case 2: 80 nodes, forced 32-row dst tiles -> 3 streamed grid steps with
    # a padded destination/source axis (exercises the multi-tile path).
    args2 = make_case(k2, 80, 16, 2, 16, 0.2)
    ref2 = reference_gat(*args2)
    out2 = jax.block_until_ready(gat_conv_pallas(*args2, max_dst_tile=32))
    assert out2.shape == (80, 2, 16)
    assert jnp.allclose(out2, ref2, atol=2e-3, rtol=2e-3), "case2 f32 mismatch"

    print("KERNEL_OK")
</pallas_src>

<mosaic_0001>
module attributes {stable_mosaic.version = 11 : i64} {
  func.func @proj_kernel(%arg0: i32, %arg1: memref<32x8xf32, #tpu.memory_space<vmem>>, %arg2: memref<8x64xf32, #tpu.memory_space<vmem>>, %arg3: memref<32x8xf32, #tpu.memory_space<vmem>>, %arg4: memref<1x32xf32, #tpu.memory_space<vmem>>, %arg5: memref<32x32xf32, #tpu.memory_space<vmem>>, %arg6: memref<32x32xf32, #tpu.memory_space<vmem>>, %arg7: memref<32x4xf32, #tpu.memory_space<vmem>>, %arg8: memref<32x4xf32, #tpu.memory_space<vmem>>) attributes {dimension_semantics = [#tpu.dimension_semantics<parallel>], iteration_bounds = array<i64: 1>, scalar_prefetch = 0 : i64, scratch_operands = 0 : i64, tpu.core_type = #tpu.core_type<tc>, window_params = [{transform_indices = @transform_0, window_bounds = array<i64: 32, 8>}, {pipeline_mode = #tpu.pipeline_mode<synchronous>, transform_indices = @transform_1, window_bounds = array<i64: 8, 64>}, {pipeline_mode = #tpu.pipeline_mode<synchronous>, transform_indices = @transform_2, window_bounds = array<i64: 32, 8>}, {pipeline_mode = #tpu.pipeline_mode<synchronous>, transform_indices = @transform_3, window_bounds = array<i64: 1, 32>}, {transform_indices = @transform_4, window_bounds = array<i64: 32, 32>}, {transform_indices = @transform_5, window_bounds = array<i64: 32, 32>}, {transform_indices = @transform_6, window_bounds = array<i64: 32, 4>}, {transform_indices = @transform_7, window_bounds = array<i64: 32, 4>}]} {
    %c0 = arith.constant 0 : index
    %c0_0 = arith.constant 0 : index
    %0 = vector.load %arg1[%c0, %c0_0] : memref<32x8xf32, #tpu.memory_space<vmem>>, vector<32x8xf32>
    %c0_1 = arith.constant 0 : index
    %c0_2 = arith.constant 0 : index
    %1 = vector.load %arg2[%c0_1, %c0_2] : memref<8x64xf32, #tpu.memory_space<vmem>>, vector<8x64xf32>
    %cst = arith.constant dense<0.000000e+00> : vector<32x64xf32>
    %2 = tpu.matmul %0, %1, %cst {dimension_numbers = #tpu.dot_dimension_numbers<[1], [0], [0], [1], [0, 0, 1, 1], [], []>} : vector<32x8xf32>, vector<8x64xf32>, vector<32x64xf32> -> vector<32x64xf32>
    %3 = vector.extract_strided_slice %2 {offsets = [0, 0], sizes = [32, 32], strides = [1, 1]} : vector<32x64xf32> to vector<32x32xf32>
    %4 = vector.extract_strided_slice %2 {offsets = [0, 32], sizes = [32, 32], strides = [1, 1]} : vector<32x64xf32> to vector<32x32xf32>
    %c0_3 = arith.constant 0 : index
    %c0_4 = arith.constant 0 : index
    %5 = vector.load %arg4[%c0_3, %c0_4] : memref<1x32xf32, #tpu.memory_space<vmem>>, vector<1x32xf32>
    %6 = vector.broadcast %5 : vector<1x32xf32> to vector<32x32xf32>
    %7 = arith.addf %4, %6 : vector<32x32xf32>
    %c0_5 = arith.constant 0 : index
    %c0_6 = arith.constant 0 : index
    %8 = vector.load %arg6[%c0_5, %c0_6] : memref<32x32xf32, #tpu.memory_space<vmem>>, vector<32x32xf32>
    tpu.vector_store %arg6[%c0_5, %c0_6], %7 {strides = array<i32>} : memref<32x32xf32, #tpu.memory_space<vmem>>, vector<32x32xf32>,
    %c0_7 = arith.constant 0 : index
    %c0_8 = arith.constant 0 : index
    %9 = vector.load %arg5[%c0_7, %c0_8] : memref<32x32xf32, #tpu.memory_space<vmem>>, vector<32x32xf32>
    tpu.vector_store %arg5[%c0_7, %c0_8], %3 {strides = array<i32>} : memref<32x32xf32, #tpu.memory_space<vmem>>, vector<32x32xf32>,
    %c0_9 = arith.constant 0 : index
    %c0_10 = arith.constant 0 : index
    %10 = vector.load %arg3[%c0_9, %c0_10] : memref<32x8xf32, #tpu.memory_space<vmem>>, vector<32x8xf32>
    %cst_11 = arith.constant dense<0.000000e+00> : vector<32x8xf32>
    %11 = tpu.matmul %3, %10, %cst_11 {dimension_numbers = #tpu.dot_dimension_numbers<[1], [0], [0], [1], [0, 0, 1, 1], [], []>} : vector<32x32xf32>, vector<32x8xf32>, vector<32x8xf32> -> vector<32x8xf32>
    %12 = vector.extract_strided_slice %11 {offsets = [0, 0], sizes = [32, 4], strides = [1, 1]} : vector<32x8xf32> to vector<32x4xf32>
    %c0_12 = arith.constant 0 : index
    %c0_13 = arith.constant 0 : index
    %13 = vector.load %arg7[%c0_12, %c0_13] : memref<32x4xf32, #tpu.memory_space<vmem>>, vector<32x4xf32>
    tpu.vector_store %arg7[%c0_12, %c0_13], %12 {strides = array<i32>} : memref<32x4xf32, #tpu.memory_space<vmem>>, vector<32x4xf32>,
    %14 = vector.extract_strided_slice %11 {offsets = [0, 4], sizes = [32, 4], strides = [1, 1]} : vector<32x8xf32> to vector<32x4xf32>
    %c0_14 = arith.constant 0 : index
    %c0_15 = arith.constant 0 : index
    %15 = vector.load %arg8[%c0_14, %c0_15] : memref<32x4xf32, #tpu.memory_space<vmem>>, vector<32x4xf32>
    tpu.vector_store %arg8[%c0_14, %c0_15], %14 {strides = array<i32>} : memref<32x4xf32, #tpu.memory_space<vmem>>, vector<32x4xf32>,
    return
  }
  func.func @transform_0(%arg0: i32) -> (i32, i32) {
    %c0_i32 = arith.constant 0 : i32
    %c0_i32_0 = arith.constant 0 : i32
    return %arg0, %c0_i32 : i32, i32
  }
  func.func @transform_1(%arg0: i32) -> (i32, i32) {
    %c0_i32 = arith.constant 0 : i32
    %c0_i32_0 = arith.constant 0 : i32
    %c0_i32_1 = arith.constant 0 : i32
    return %c0_i32, %c0_i32_0 : i32, i32
  }
  func.func @transform_2(%arg0: i32) -> (i32, i32) {
    %c0_i32 = arith.constant 0 : i32
    %c0_i32_0 = arith.constant 0 : i32
    %c0_i32_1 = arith.constant 0 : i32
    return %c0_i32, %c0_i32_0 : i32, i32
  }
  func.func @transform_3(%arg0: i32) -> (i32, i32) {
    %c0_i32 = arith.constant 0 : i32
    %c0_i32_0 = arith.constant 0 : i32
    %c0_i32_1 = arith.constant 0 : i32
    return %c0_i32, %c0_i32_0 : i32, i32
  }
  func.func @transform_4(%arg0: i32) -> (i32, i32) {
    %c0_i32 = arith.constant 0 : i32
    %c0_i32_0 = arith.constant 0 : i32
    return %arg0, %c0_i32 : i32, i32
  }
  func.func @transform_5(%arg0: i32) -> (i32, i32) {
    %c0_i32 = arith.constant 0 : i32
    %c0_i32_0 = arith.constant 0 : i32
    return %arg0, %c0_i32 : i32, i32
  }
  func.func @transform_6(%arg0: i32) -> (i32, i32) {
    %c0_i32 = arith.constant 0 : i32
    %c0_i32_0 = arith.constant 0 : i32
    return %arg0, %c0_i32 : i32, i32
  }
  func.func @transform_7(%arg0: i32) -> (i32, i32) {
    %c0_i32 = arith.constant 0 : i32
    %c0_i32_0 = arith.constant 0 : i32
    return %arg0, %c0_i32 : i32, i32
  }
}

module attributes {stable_mosaic.version = 11 : i64} {
  func.func @proj_kernel(%arg0: i32, %arg1: memref<32x8xf32, #tpu.memory_space<vmem>>, %arg2: memref<8x64xf32, #tpu.memory_space<vmem>>, %arg3: memref<32x8xf32, #tpu.memory_space<vmem>>, %arg4: memref<1x32xf32, #tpu.memory_space<vmem>>, %arg5: memref<32x32xf32, #tpu.memory_space<vmem>>, %arg6: memref<32x32xf32, #tpu.memory_space<vmem>>, %arg7: memref<32x4xf32, #tpu.memory_space<vmem>>, %arg8: memref<32x4xf32, #tpu.memory_space<vmem>>) attributes {dimension_semantics = [#tpu.dimension_semantics<parallel>], iteration_bounds = array<i64: 1>, scalar_prefetch = 0 : i64, scratch_operands = 0 : i64, tpu.core_type = #tpu.core_type<tc>, window_params = [{transform_indices = @transform_0, window_bounds = array<i64: 32, 8>}, {pipeline_mode = #tpu.pipeline_mode<synchronous>, transform_indices = @transform_1, window_bounds = array<i64: 8, 64>}, {pipeline_mode = #tpu.pipeline_mode<synchronous>, transform_indices = @transform_2, window_bounds = array<i64: 32, 8>}, {pipeline_mode = #tpu.pipeline_mode<synchronous>, transform_indices = @transform_3, window_bounds = array<i64: 1, 32>}, {transform_indices = @transform_4, window_bounds = array<i64: 32, 32>}, {transform_indices = @transform_5, window_bounds = array<i64: 32, 32>}, {transform_indices = @transform_6, window_bounds = array<i64: 32, 4>}, {transform_indices = @transform_7, window_bounds = array<i64: 32, 4>}]} {
    %c0 = arith.constant 0 : index
    %c0_0 = arith.constant 0 : index
    %0 = vector.load %arg1[%c0, %c0_0] : memref<32x8xf32, #tpu.memory_space<vmem>>, vector<32x8xf32>
    %c0_1 = arith.constant 0 : index
    %c0_2 = arith.constant 0 : index
    %1 = vector.load %arg2[%c0_1, %c0_2] : memref<8x64xf32, #tpu.memory_space<vmem>>, vector<8x64xf32>
    %cst = arith.constant dense<0.000000e+00> : vector<32x64xf32>
    %2 = tpu.matmul %0, %1, %cst {dimension_numbers = #tpu.dot_dimension_numbers<[1], [0], [0], [1], [0, 0, 1, 1], [], []>} : vector<32x8xf32>, vector<8x64xf32>, vector<32x64xf32> -> vector<32x64xf32>
    %3 = vector.extract_strided_slice %2 {offsets = [0, 0], sizes = [32, 32], strides = [1, 1]} : vector<32x64xf32> to vector<32x32xf32>
    %4 = vector.extract_strided_slice %2 {offsets = [0, 32], sizes = [32, 32], strides = [1, 1]} : vector<32x64xf32> to vector<32x32xf32>
    %c0_3 = arith.constant 0 : index
    %c0_4 = arith.constant 0 : index
    %5 = vector.load %arg4[%c0_3, %c0_4] : memref<1x32xf32, #tpu.memory_space<vmem>>, vector<1x32xf32>
    %6 = vector.broadcast %5 : vector<1x32xf32> to vector<32x32xf32>
    %7 = arith.addf %4, %6 : vector<32x32xf32>
    %c0_5 = arith.constant 0 : index
    %c0_6 = arith.constant 0 : index
    %8 = vector.load %arg6[%c0_5, %c0_6] : memref<32x32xf32, #tpu.memory_space<vmem>>, vector<32x32xf32>
    tpu.vector_store %arg6[%c0_5, %c0_6], %7 {strides = array<i32>} : memref<32x32xf32, #tpu.memory_space<vmem>>, vector<32x32xf32>,
    %c0_7 = arith.constant 0 : index
    %c0_8 = arith.constant 0 : index
    %9 = vector.load %arg5[%c0_7, %c0_8] : memref<32x32xf32, #tpu.memory_space<vmem>>, vector<32x32xf32>
    tpu.vector_store %arg5[%c0_7, %c0_8], %3 {strides = array<i32>} : memref<32x32xf32, #tpu.memory_space<vmem>>, vector<32x32xf32>,
    %c0_9 = arith.constant 0 : index
    %c0_10 = arith.constant 0 : index
    %10 = vector.load %arg3[%c0_9, %c0_10] : memref<32x8xf32, #tpu.memory_space<vmem>>, vector<32x8xf32>
    %cst_11 = arith.constant dense<0.000000e+00> : vector<32x8xf32>
    %11 = tpu.matmul %3, %10, %cst_11 {dimension_numbers = #tpu.dot_dimension_numbers<[1], [0], [0], [1], [0, 0, 1, 1], [], []>} : vector<32x32xf32>, vector<32x8xf32>, vector<32x8xf32> -> vector<32x8xf32>
    %12 = vector.extract_strided_slice %11 {offsets = [0, 0], sizes = [32, 4], strides = [1, 1]} : vector<32x8xf32> to vector<32x4xf32>
    %c0_12 = arith.constant 0 : index
    %c0_13 = arith.constant 0 : index
    %13 = vector.load %arg7[%c0_12, %c0_13] : memref<32x4xf32, #tpu.memory_space<vmem>>, vector<32x4xf32>
    tpu.vector_store %arg7[%c0_12, %c0_13], %12 {strides = array<i32>} : memref<32x4xf32, #tpu.memory_space<vmem>>, vector<32x4xf32>,
    %14 = vector.extract_strided_slice %11 {offsets = [0, 4], sizes = [32, 4], strides = [1, 1]} : vector<32x8xf32> to vector<32x4xf32>
    %c0_14 = arith.constant 0 : index
    %c0_15 = arith.constant 0 : index
    %15 = vector.load %arg8[%c0_14, %c0_15] : memref<32x4xf32, #tpu.memory_space<vmem>>, vector<32x4xf32>
    tpu.vector_store %arg8[%c0_14, %c0_15], %14 {strides = array<i32>} : memref<32x4xf32, #tpu.memory_space<vmem>>, vector<32x4xf32>,
    return
  }
  func.func @transform_0(%arg0: i32) -> (i32, i32) {
    %c0_i32 = arith.constant 0 : i32
    %c0_i32_0 = arith.constant 0 : i32
    return %arg0, %c0_i32 : i32, i32
  }
  func.func @transform_1(%arg0: i32) -> (i32, i32) {
    %c0_i32 = arith.constant 0 : i32
    %c0_i32_0 = arith.constant 0 : i32
    %c0_i32_1 = arith.constant 0 : i32
    return %c0_i32, %c0_i32_0 : i32, i32
  }
  func.func @transform_2(%arg0: i32) -> (i32, i32) {
    %c0_i32 = arith.constant 0 : i32
    %c0_i32_0 = arith.constant 0 : i32
    %c0_i32_1 = arith.constant 0 : i32
    return %c0_i32, %c0_i32_0 : i32, i32
  }
  func.func @transform_3(%arg0: i32) -> (i32, i32) {
    %c0_i32 = arith.constant 0 : i32
    %c0_i32_0 = arith.constant 0 : i32
    %c0_i32_1 = arith.constant 0 : i32
    return %c0_i32, %c0_i32_0 : i32, i32
  }
  func.func @transform_4(%arg0: i32) -> (i32, i32) {
    %c0_i32 = arith.constant 0 : i32
    %c0_i32_0 = arith.constant 0 : i32
    return %arg0, %c0_i32 : i32, i32
  }
  func.func @transform_5(%arg0: i32) -> (i32, i32) {
    %c0_i32 = arith.constant 0 : i32
    %c0_i32_0 = arith.constant 0 : i32
    return %arg0, %c0_i32 : i32, i32
  }
  func.func @transform_6(%arg0: i32) -> (i32, i32) {
    %c0_i32 = arith.constant 0 : i32
    %c0_i32_0 = arith.constant 0 : i32
    return %arg0, %c0_i32 : i32, i32
  }
  func.func @transform_7(%arg0: i32) -> (i32, i32) {
    %c0_i32 = arith.constant 0 : i32
    %c0_i32_0 = arith.constant 0 : i32
    return %arg0, %c0_i32 : i32, i32
  }
}

</mosaic_0001>

<bundles_post_ra>
// kernel: tpu_custom_call.1
= control target key start
LH: loop header
LB: loop body
LE: loop exit
PB: predicated region body
PF: predicated region fallthrough
CT: control target
= control target key end

     0   :  { %13 = vsyncpa [#allocation3], 0  ;;  %s863_s0 = inlined_call_operand.hbm [shape: f32[32,8], index: 0, kind: input, shape index: {}]   ;;  %s864_s1 = inlined_call_operand.hbm [shape: f32[8,64], index: 1, kind: input, shape index: {}]   ;;  %s865_s2 = inlined_call_operand.hbm [shape: f32[32,8], index: 2, kind: input, shape index: {}]   ;;  %s866_s3 = inlined_call_operand.hbm [shape: f32[1,32], index: 3, kind: input, shape index: {}]   ;;  %s867_s4 = inlined_call_operand.hbm [shape: f32[32,32], index: 4, kind: output, shape index: {0}]   ;;  %s868_s5 = inlined_call_operand.hbm [shape: f32[32,32], index: 5, kind: output, shape index: {1}]   ;;  %s869_s6 = inlined_call_operand.hbm [shape: f32[32,4], index: 6, kind: output, shape index: {2}]   ;;  %s870_s7 = inlined_call_operand.hbm [shape: f32[32,4], index: 7, kind: output, shape index: {3}]  }
   0x1   :  { %14 = vsyncpa [#allocation6], 0 }
   0x2   :  { %15 = vsyncpa [#allocation9], 0 }
   0x3   :  { %16 = vsyncpa [#allocation4], 0 }
   0x4   :  { %17 = vsyncpa [#allocation12], 0 }
   0x5   :  { %18 = vsyncpa [#allocation15], 0  ;;  %s665_s24 = smov [#allocation5]   ;;  %s666_s26 = smov [#allocation2]  }
   0x6   :  { %s37_s25 = sshll.u32 %s665_s24, 4  ;;  %s24_s27 = sshll.u32 %s666_s26, 4  ;;  %s38_s25 = int_to_ptr.vmem [resolvable:$true] %s37_s25  ;;  %s718_s27 = int_to_ptr.vmem [resolvable:$true] %s24_s27 }
   0x7   :  { %s477_s30 = scalar_lea.hbm %s864_s1, 128 }
   0x8   :  { %p478_p0 = scmp.ne.s32.totalorder %s864_s1, %s477_s30  ;;  %p481_p1 = scmp.lt.u32.totalorder %s477_s30, %s864_s1 }
   0xa   :  { %p483_p2 = pnand %p481_p1, %p478_p0 }
   0xc   :  { %486 = shalt.err (!%p483_p2)
}
   0xd   :  { %s487_s12 = scalar_lea.vmem %s38_s25, 128  ;;  %p492_p4 = scmp.lt.s32.totalorder %s38_s25, %s38_s25 }
   0xe   :  { %p488_p3 = scmp.ne.s32.totalorder %s38_s25, %s487_s12  ;;  %p493_p5 = scmp.lt.s32.totalorder %s487_s12, %s487_s12 }
  0x10   :  { %p494_p6 = por %p493_p5, %p492_p4 }
  0x12   :  { %p495_p7 = pnand %p494_p6, %p488_p3 }
  0x14   :  { %498 = shalt.err (!%p495_p7)
}
  0x15   :  { %40 = dma.hbm_to_vmem [thread:$0]  %s864_s1, 128, %s38_s25, [#allocation6]  }
  0x16   :  { %s499_s17 = scalar_lea.hbm %s863_s0, 512 }
  0x17   :  { %p500_p8 = scmp.ne.s32.totalorder %s863_s0, %s499_s17  ;;  %p503_p9 = scmp.lt.u32.totalorder %s499_s17, %s863_s0 }
  0x19   :  { %p505_p10 = pnand %p503_p9, %p500_p8 }
  0x1b   :  { %508 = shalt.err (!%p505_p10)
}
  0x1c   :  { %s509_s22 = scalar_lea.vmem %s718_s27, 512  ;;  %p514_p12 = scmp.lt.s32.totalorder %s718_s27, %s718_s27 }
  0x1d   :  { %p510_p11 = scmp.ne.s32.totalorder %s718_s27, %s509_s22  ;;  %p515_p13 = scmp.lt.s32.totalorder %s509_s22, %s509_s22 }
  0x1f   :  { %p516_p0 = por %p515_p13, %p514_p12 }
  0x21   :  { %p517_p1 = pnand %p516_p0, %p510_p11 }
  0x23   :  { %520 = shalt.err (!%p517_p1)
}
  0x24   :  { %s667_s1 = smov 128   ;;  %s668_s23 = smov 8  }
  0x25   :  { %30 = dma.hbm_to_vmem [thread:$0]  %s863_s0, 512, %s718_s27, [#allocation3], %s667_s1, %s667_s1, %s668_s23  }
  0x26   :  { %s669_s26 = smov [#allocation7]   ;;  %s670_s29 = smov [#allocation8]  }
  0x27   :  { %s46_s28 = sshll.u32 %s669_s26, 4  ;;  %s59_s30 = sshll.u32 %s670_s29, 4  ;;  %s47_s28 = int_to_ptr.vmem [resolvable:$true] %s46_s28  ;;  %s60_s30 = int_to_ptr.vmem [resolvable:$true] %s59_s30 }
  0x28   :  { %s521_s10 = scalar_lea.hbm %s865_s2, 512 }
  0x29   :  { %p522_p2 = scmp.ne.s32.totalorder %s865_s2, %s521_s10  ;;  %p525_p3 = scmp.lt.u32.totalorder %s521_s10, %s865_s2 }
  0x2b   :  { %p527_p4 = pnand %p525_p3, %p522_p2 }
  0x2d   :  { %530 = shalt.err (!%p527_p4)
}
  0x2e   :  { %s531_s0 = scalar_lea.vmem %s47_s28, 512  ;;  %p536_p6 = scmp.lt.s32.totalorder %s47_s28, %s47_s28 }
  0x2f   :  { %p532_p5 = scmp.ne.s32.totalorder %s47_s28, %s531_s0  ;;  %p537_p7 = scmp.lt.s32.totalorder %s531_s0, %s531_s0 }
  0x31   :  { %p538_p8 = por %p537_p7, %p536_p6 }
  0x33   :  { %p539_p9 = pnand %p538_p8, %p532_p5 }
  0x35   :  { %542 = shalt.err (!%p539_p9)
}
  0x36   :  { %52 = dma.hbm_to_vmem [thread:$0]  %s865_s2, 512, %s47_s28, [#allocation6], %s667_s1, %s667_s1, %s668_s23  }
  0x37   :  { %s543_s18 = scalar_lea.hbm %s866_s3, 16 }
  0x38   :  { %p544_p10 = scmp.ne.s32.totalorder %s866_s3, %s543_s18  ;;  %p547_p11 = scmp.lt.u32.totalorder %s543_s18, %s866_s3 }
  0x3a   :  { %p549_p12 = pnand %p547_p11, %p544_p10 }
  0x3c   :  { %552 = shalt.err (!%p549_p12)
}
  0x3d   :  { %s553_s24 = scalar_lea.vmem %s60_s30, 16  ;;  %s557_s25 = scalar_lea.vmem %s60_s30, 32 }
  0x3e   :  { %p554_p13 = scmp.ne.s32.totalorder %s60_s30, %s553_s24  ;;  %p558_p0 = scmp.lt.s32.totalorder %s60_s30, %s60_s30 }
  0x3f   :  { %p559_p1 = scmp.lt.s32.totalorder %s557_s25, %s553_s24 }
  0x41   :  { %p560_p2 = por %p559_p1, %p558_p0 }
  0x43   :  { %p561_p3 = pnand %p560_p2, %p554_p13 }
  0x45   :  { %564 = shalt.err (!%p561_p3)
}
  0x46   :  { %62 = dma.hbm_to_vmem [thread:$0]  %s866_s3, 16, %s60_s30, [#allocation9]  }
  0x47   :  { %653 = dma.done.wait [#allocation3], 512  }
  0x48   :  { %654 = vsyncadd [#allocation3], 4294966784 }
  0x49   :  { %655 = dma.done.wait [#allocation6], 640  }
  0x4a   :  { %656 = vsyncadd [#allocation6], 4294966656 }
  0x4b   :  { %657 = dma.done.wait [#allocation9], 16  }
  0x4c   :  { %658 = vsyncadd [#allocation9], 4294967280  ;;  %vm80_vm0 = vcmask 64512   ;;  %v79_v0 = vld [vmem:[#allocation5] sm:$0xff]  ;;  %v76_v2 = vld [vmem:[#allocation2 + $0x8] sm:$0xff]  ;;  %s671_s28 = smov 32  }
  0x4d   :  { %v75_v1 = vld [vmem:[#allocation2] sm:$0xff]  ;;  %430 = vmatprep.subr.mxu0 %v79_v0  ;;  %v77_v3 = vld [vmem:[#allocation2 + $0x10] sm:$0xff]  ;;  %v412_v4 = vld [vmem:[#allocation8] ss:$0 sm:$0xff]  ;;  %vm207_vm1 = vcmask 261120   ;;  %s672_s3 = smov 96  }
  0x4e   :  { %432 = vmatprep.mubr.msk.f32.mxu0 %vm80_vm0, %v75_v1  ;;  %431 = vmatpush3.msra.mxu0 %v79_v0  ;;  %v216_v5 = vld [vmem:[#allocation7] sm:$0xff]  ;;  %v217_v6 = vld [vmem:[#allocation7 + $0x8] sm:$0xff]  ;;  %v218_v7 = vld [vmem:[#allocation7 + $0x10] sm:$0xff]  ;;  %s673_s29 = smov [#allocation11]   ;;  %s674_s8 = smov [#allocation10]  }
  0x4f   :  { %184 = vrot.lane.b32.xlu0 %v412_v4, %s671_s28  ;;  %433 = vmatmul.mubr.msk.f32.vlgmr.msra.gmra.mrb[0].mxu0 %vm80_vm0, %v76_v2  ;;  %v452_v8 = vpack.c.bf16 %v217_v6, %v216_v5  ;;  %v219_v9 = vld [vmem:[#allocation7 + $0x18] sm:$0xff]  ;;  %v78_v10 = vld [vmem:[#allocation2 + $0x18] sm:$0xff]  ;;  %s359_s30 = sshll.u32 %s673_s29, 4  ;;  %s347_s9 = sshll.u32 %s674_s8, 4  ;;  %s360_s30 = int_to_ptr.vmem [resolvable:$true] %s359_s30  ;;  %s348_s9 = int_to_ptr.vmem [resolvable:$true] %s347_s9 }
  0x50   :  { %435 = vmatprep.mubr.msk.f32.mxu0 %vm80_vm0, %v77_v3  ;;  %v456_v11 = vpack.c.bf16 %v219_v9, %v218_v7  ;;  %s565_s10 = scalar_lea.vmem %s360_s30, 512  ;;  %p570_p5 = scmp.lt.s32.totalorder %s360_s30, %s360_s30 }
  0x51   :  { %453 = vmatprep.subr.bf16.mxu0 %v452_v8  ;;  %460 = vmatprep.subr.bf16.mxu1 %v452_v8  ;;  %p566_p4 = scmp.ne.s32.totalorder %s360_s30, %s565_s10  ;;  %p571_p6 = scmp.lt.s32.totalorder %s565_s10, %s565_s10 }
  0x52   :  { %455 = vmatpush3.bf16.msra.mxu0 %v452_v8  ;;  %462 = vmatpush3.bf16.msra.mxu1 %v452_v8 }
  0x53   :  { %436 = vmatmul.mubr.msk.f32.gmra.mrb[2].mxu0 %vm80_vm0, %v78_v10  ;;  %457 = vmatprep.subr.bf16.mxu0 %v456_v11  ;;  %p572_p7 = por %p571_p6, %p570_p5 }
  0x54   :  { %461 = vmatprep.subr.bf16.mxu1 %v456_v11 }
  0x55   :  { %p573_p8 = pnand %p572_p7, %p566_p4 }
  0x56   :  { %459 = vmatpush3.bf16.msra.mxu0 %v456_v11  ;;  %463 = vmatpush3.bf16.msra.mxu1 %v456_v11 }
  0xc1   :  { %v185_v12 = vpop.permute.xlu0 %184 }
 0x122   :  { %v434_v13 = vpop.f32.mrb[0].mxu0 }
 0x123   :  { %213 = vst.msk [vmem:[#allocation10 + $0x8] sm:$0xff] %vm207_vm1, %v434_v13  ;;  %v159_v14 = vpop.f32.mrb[1].mxu0  ;;  %v188_v15 = vadd.f32 %v434_v13, %v185_v12 }
 0x124   :  { %v187_v16 = vadd.f32 %v185_v12, %v159_v14  ;;  %212 = vst.msk [vmem:[#allocation10] sm:$0xff] %vm207_vm1, %v159_v14  ;;  %446 = vmatprep.mubr.msk.f32.mxu0 %vm207_vm1, %v159_v14 }
 0x125   :  { %197 = vrot.lane.b32.xlu1 %v188_v15, %s672_s3  ;;  %447 = vmatmul.mubr.msk.f32.vlgmr.msra.gmra.mrb[4].mxu0 %vm207_vm1, %v434_v13 }
 0x126   :  { %195 = vrot.lane.b32.xlu0 %v187_v16, %s672_s3  ;;  %v437_v17 = vpop.f32.mrb[2].mxu0 }
 0x127   :  { %v190_v18 = vadd.f32 %v437_v17, %v185_v12  ;;  %215 = vst.msk [vmem:[#allocation10 + $0x18] sm:$0xff] %vm207_vm1, %v437_v17  ;;  %v169_v19 = vpop.f32.mrb[3].mxu0 }
 0x128   :  { %v189_v20 = vadd.f32 %v185_v12, %v169_v19  ;;  %214 = vst.msk [vmem:[#allocation10 + $0x10] sm:$0xff] %vm207_vm1, %v169_v19  ;;  %449 = vmatprep.mubr.msk.f32.mxu1 %vm207_vm1, %v169_v19 }
 0x129   :  { %450 = vmatmul.mubr.msk.f32.vlgmr.msra.gmra.mrb[0].mxu1 %vm207_vm1, %v437_v17 }
 0x12a   :  { %201 = vrot.lane.b32.xlu0 %v190_v18, %s672_s3  ;;  %199 = vrot.lane.b32.xlu1 %v189_v20, %s672_s3 }
 0x197   :  { %v198_v21 = vpop.permute.xlu1 %197 }
 0x198   :  { %209 = vst.msk [vmem:[#allocation11 + $0x8] sm:$0xff] %vm207_vm1, %v198_v21  ;;  %v196_v22 = vpop.permute.xlu0 %195 }
 0x199   :  { %208 = vst.msk [vmem:[#allocation11] sm:$0xff] %vm207_vm1, %v196_v22 }
 0x19c   :  { %v202_v23 = vpop.permute.xlu0 %201  ;;  %v200_v24 = vpop.permute.xlu1 %199 }
 0x19d   :  { %211 = vst.msk [vmem:[#allocation11 + $0x18] sm:$0xff] %vm207_vm1, %v202_v23  ;;  %210 = vst.msk [vmem:[#allocation11 + $0x10] sm:$0xff] %vm207_vm1, %v200_v24 }
 0x19e   :  { %576 = shalt.err (!%p573_p8)
}
 0x19f   :  { %s577_s13 = scalar_lea.hbm %s868_s5, 512 }
 0x1a0   :  { %p578_p9 = scmp.ne.s32.totalorder %s868_s5, %s577_s13  ;;  %p581_p10 = scmp.lt.u32.totalorder %s577_s13, %s868_s5 }
 0x1a2   :  { %p583_p11 = pnand %p581_p10, %p578_p9 }
 0x1a4   :  { %586 = shalt.err (!%p583_p11)
}
 0x1a5   :  { %365 = dma.vmem_to_hbm [thread:$0]  %s360_s30, 512, %s868_s5, [#allocation12], %s667_s1, %s667_s1, %s668_s23  }
 0x1a6   :  { %s587_s18 = scalar_lea.vmem %s348_s9, 512  ;;  %p592_p13 = scmp.lt.s32.totalorder %s348_s9, %s348_s9 }
 0x1a7   :  { %p588_p12 = scmp.ne.s32.totalorder %s348_s9, %s587_s18  ;;  %p593_p0 = scmp.lt.s32.totalorder %s587_s18, %s587_s18 }
 0x1a9   :  { %p594_p1 = por %p593_p0, %p592_p13 }
 0x1ab   :  { %p595_p2 = pnand %p594_p1, %p588_p12 }
 0x1ad   :  { %598 = shalt.err (!%p595_p2)
}
 0x1ae   :  { %s599_s21 = scalar_lea.hbm %s867_s4, 512 }
 0x1af   :  { %p600_p3 = scmp.ne.s32.totalorder %s867_s4, %s599_s21  ;;  %p603_p4 = scmp.lt.u32.totalorder %s599_s21, %s867_s4 }
 0x1b1   :  { %p605_p5 = pnand %p603_p4, %p600_p3 }
 0x1b3   :  { %608 = shalt.err (!%p605_p5)
}
 0x1b4   :  { %353 = dma.vmem_to_hbm [thread:$0]  %s348_s9, 512, %s867_s4, [#allocation4], %s667_s1, %s667_s1, %s668_s23   ;;  %vm317_vm2 = vcmask 31744  }
 0x1b5   :  { %s675_s28 = smov 124   ;;  %s676_s3 = smov [#allocation13]  }
 0x1b6   :  { %s371_s29 = sshll.u32 %s676_s3, 4  ;;  %s372_s29 = int_to_ptr.vmem [resolvable:$true] %s371_s29 }
 0x1b7   :  { %s609_s4 = scalar_lea.vmem %s372_s29, 512  ;;  %p614_p7 = scmp.lt.s32.totalorder %s372_s29, %s372_s29 }
 0x1b8   :  { %p610_p6 = scmp.ne.s32.totalorder %s372_s29, %s609_s4  ;;  %p615_p8 = scmp.lt.s32.totalorder %s609_s4, %s609_s4 }
 0x1ba   :  { %p616_p9 = por %p615_p8, %p614_p7 }
 0x1bc   :  { %p617_p10 = pnand %p616_p9, %p610_p6 }
 0x1f8   :  { %v448_v25 = vpop.f32.mrb[4].mxu0 }
 0x1f9   :  { %319 = vst.msk [vmem:[#allocation13 + $0x8] sm:$0xff] %vm317_vm2, %v448_v25  ;;  %328 = vrot.lane.b32.xlu0 %v448_v25, %s675_s28  ;;  %v298_v26 = vpop.f32.mrb[5].mxu0 }
 0x1fa   :  { %318 = vst.msk [vmem:[#allocation13] sm:$0xff] %vm317_vm2, %v298_v26  ;;  %326 = vrot.lane.b32.xlu1 %v298_v26, %s675_s28 }
 0x1fc   :  { %v451_v27 = vpop.f32.mrb[0].mxu1 }
 0x1fd   :  { %321 = vst.msk [vmem:[#allocation13 + $0x18] sm:$0xff] %vm317_vm2, %v451_v27  ;;  %v308_v28 = vpop.f32.mrb[1].mxu1  ;;  %332 = vrot.lane.b32.xlu0 %v451_v27, %s675_s28 }
 0x1fe   :  { %320 = vst.msk [vmem:[#allocation13 + $0x10] sm:$0xff] %vm317_vm2, %v308_v28  ;;  %330 = vrot.lane.b32.xlu1 %v308_v28, %s675_s28 }
 0x1ff   :  { %620 = shalt.err (!%p617_p10)
}
 0x200   :  { %s621_s9 = scalar_lea.hbm %s869_s6, 512 }
 0x201   :  { %p622_p11 = scmp.ne.s32.totalorder %s869_s6, %s621_s9  ;;  %p625_p12 = scmp.lt.u32.totalorder %s621_s9, %s869_s6 }
 0x203   :  { %p627_p13 = pnand %p625_p12, %p622_p11 }
 0x205   :  { %630 = shalt.err (!%p627_p13)
}
 0x206   :  { %377 = dma.vmem_to_hbm [thread:$0]  %s372_s29, 512, %s869_s6, [#allocation12], %s667_s1, %s667_s1, %s668_s23  }
 0x207   :  { %s677_s27 = smov [#allocation14]  }
 0x208   :  { %s383_s15 = sshll.u32 %s677_s27, 4  ;;  %s384_s15 = int_to_ptr.vmem [resolvable:$true] %s383_s15 }
 0x209   :  { %s631_s16 = scalar_lea.vmem %s384_s15, 512  ;;  %p636_p1 = scmp.lt.s32.totalorder %s384_s15, %s384_s15 }
 0x20a   :  { %p632_p0 = scmp.ne.s32.totalorder %s384_s15, %s631_s16  ;;  %p637_p2 = scmp.lt.s32.totalorder %s631_s16, %s631_s16 }
 0x20c   :  { %p638_p3 = por %p637_p2, %p636_p1 }
 0x20e   :  { %p639_p4 = pnand %p638_p3, %p632_p0 }
 0x26b   :  { %v329_v29 = vpop.permute.xlu0 %328 }
 0x26c   :  { %339 = vst.msk [vmem:[#allocation14 + $0x8] sm:$0xff] %vm317_vm2, %v329_v29  ;;  %v327_v30 = vpop.permute.xlu1 %326 }
 0x26d   :  { %338 = vst.msk [vmem:[#allocation14] sm:$0xff] %vm317_vm2, %v327_v30 }
 0x26f   :  { %v333_v31 = vpop.permute.xlu0 %332 }
 0x270   :  { %341 = vst.msk [vmem:[#allocation14 + $0x18] sm:$0xff] %vm317_vm2, %v333_v31  ;;  %v331_v32 = vpop.permute.xlu1 %330 }
 0x271   :  { %340 = vst.msk [vmem:[#allocation14 + $0x10] sm:$0xff] %vm317_vm2, %v331_v32 }
 0x272   :  { %642 = shalt.err (!%p639_p4)
}
 0x273   :  { %s643_s18 = scalar_lea.hbm %s870_s7, 512 }
 0x274   :  { %p644_p5 = scmp.ne.s32.totalorder %s870_s7, %s643_s18  ;;  %p647_p6 = scmp.lt.u32.totalorder %s643_s18, %s870_s7 }
 0x276   :  { %p649_p7 = pnand %p647_p6, %p644_p5 }
 0x278   :  { %652 = shalt.err (!%p649_p7)
}
 0x279   :  { %389 = dma.vmem_to_hbm [thread:$0]  %s384_s15, 512, %s870_s7, [#allocation15], %s667_s1, %s667_s1, %s668_s23  }
 0x27a   :  { %659 = dma.done.wait [#allocation4], 512  }
 0x27b   :  { %660 = vsyncadd [#allocation4], 4294966784 }
 0x27c   :  { %661 = dma.done.wait [#allocation12], 1024  }
 0x27d   :  { %662 = vsyncadd [#allocation12], 4294966272 }
 0x27e   :  { %663 = dma.done.wait [#allocation15], 512  }
 0x27f   :  { %664 = vsyncadd [#allocation15], 4294966784 }
 0x280   :  { %402 = vsyncpa [#allocation3], 1 }
 0x281   :  { %403 = vsyncpa [#allocation6], 1 }
 0x282   :  { %404 = vsyncpa [#allocation9], 1 }
 0x283   :  { %405 = vsyncpa [#allocation4], 1 }
 0x284   :  { %406 = vsyncpa [#allocation12], 1 }
 0x285   :  { %407 = vsyncpa [#allocation15], 1 }

// kernel: tpu_custom_call.1
= control target key start
LH: loop header
LB: loop body
LE: loop exit
PB: predicated region body
PF: predicated region fallthrough
CT: control target
= control target key end

     0   :  { %13 = vsyncpa [#allocation3], 0  ;;  %s863_s0 = inlined_call_operand.hbm [shape: f32[32,8], index: 0, kind: input, shape index: {}]   ;;  %s864_s1 = inlined_call_operand.hbm [shape: f32[8,64], index: 1, kind: input, shape index: {}]   ;;  %s865_s2 = inlined_call_operand.hbm [shape: f32[32,8], index: 2, kind: input, shape index: {}]   ;;  %s866_s3 = inlined_call_operand.hbm [shape: f32[1,32], index: 3, kind: input, shape index: {}]   ;;  %s867_s4 = inlined_call_operand.hbm [shape: f32[32,32], index: 4, kind: output, shape index: {0}]   ;;  %s868_s5 = inlined_call_operand.hbm [shape: f32[32,32], index: 5, kind: output, shape index: {1}]   ;;  %s869_s6 = inlined_call_operand.hbm [shape: f32[32,4], index: 6, kind: output, shape index: {2}]   ;;  %s870_s7 = inlined_call_operand.hbm [shape: f32[32,4], index: 7, kind: output, shape index: {3}]  }
   0x1   :  { %14 = vsyncpa [#allocation6], 0 }
   0x2   :  { %15 = vsyncpa [#allocation9], 0 }
   0x3   :  { %16 = vsyncpa [#allocation4], 0 }
   0x4   :  { %17 = vsyncpa [#allocation12], 0 }
   0x5   :  { %18 = vsyncpa [#allocation15], 0  ;;  %s665_s24 = smov [#allocation5]   ;;  %s666_s26 = smov [#allocation2]  }
   0x6   :  { %s37_s25 = sshll.u32 %s665_s24, 4  ;;  %s24_s27 = sshll.u32 %s666_s26, 4  ;;  %s38_s25 = int_to_ptr.vmem [resolvable:$true] %s37_s25  ;;  %s718_s27 = int_to_ptr.vmem [resolvable:$true] %s24_s27 }
   0x7   :  { %s477_s30 = scalar_lea.hbm %s864_s1, 128 }
   0x8   :  { %p478_p0 = scmp.ne.s32.totalorder %s864_s1, %s477_s30  ;;  %p481_p1 = scmp.lt.u32.totalorder %s477_s30, %s864_s1 }
   0xa   :  { %p483_p2 = pnand %p481_p1, %p478_p0 }
   0xc   :  { %486 = shalt.err (!%p483_p2)
}
   0xd   :  { %s487_s12 = scalar_lea.vmem %s38_s25, 128  ;;  %p492_p4 = scmp.lt.s32.totalorder %s38_s25, %s38_s25 }
   0xe   :  { %p488_p3 = scmp.ne.s32.totalorder %s38_s25, %s487_s12  ;;  %p493_p5 = scmp.lt.s32.totalorder %s487_s12, %s487_s12 }
  0x10   :  { %p494_p6 = por %p493_p5, %p492_p4 }
  0x12   :  { %p495_p7 = pnand %p494_p6, %p488_p3 }
  0x14   :  { %498 = shalt.err (!%p495_p7)
}
  0x15   :  { %40 = dma.hbm_to_vmem [thread:$0]  %s864_s1, 128, %s38_s25, [#allocation6]  }
  0x16   :  { %s499_s17 = scalar_lea.hbm %s863_s0, 512 }
  0x17   :  { %p500_p8 = scmp.ne.s32.totalorder %s863_s0, %s499_s17  ;;  %p503_p9 = scmp.lt.u32.totalorder %s499_s17, %s863_s0 }
  0x19   :  { %p505_p10 = pnand %p503_p9, %p500_p8 }
  0x1b   :  { %508 = shalt.err (!%p505_p10)
}
  0x1c   :  { %s509_s22 = scalar_lea.vmem %s718_s27, 512  ;;  %p514_p12 = scmp.lt.s32.totalorder %s718_s27, %s718_s27 }
  0x1d   :  { %p510_p11 = scmp.ne.s32.totalorder %s718_s27, %s509_s22  ;;  %p515_p13 = scmp.lt.s32.totalorder %s509_s22, %s509_s22 }
  0x1f   :  { %p516_p0 = por %p515_p13, %p514_p12 }
  0x21   :  { %p517_p1 = pnand %p516_p0, %p510_p11 }
  0x23   :  { %520 = shalt.err (!%p517_p1)
}
  0x24   :  { %s667_s1 = smov 128   ;;  %s668_s23 = smov 8  }
  0x25   :  { %30 = dma.hbm_to_vmem [thread:$0]  %s863_s0, 512, %s718_s27, [#allocation3], %s667_s1, %s667_s1, %s668_s23  }
  0x26   :  { %s669_s26 = smov [#allocation7]   ;;  %s670_s29 = smov [#allocation8]  }
  0x27   :  { %s46_s28 = sshll.u32 %s669_s26, 4  ;;  %s59_s30 = sshll.u32 %s670_s29, 4  ;;  %s47_s28 = int_to_ptr.vmem [resolvable:$true] %s46_s28  ;;  %s60_s30 = int_to_ptr.vmem [resolvable:$true] %s59_s30 }
  0x28   :  { %s521_s10 = scalar_lea.hbm %s865_s2, 512 }
  0x29   :  { %p522_p2 = scmp.ne.s32.totalorder %s865_s2, %s521_s10  ;;  %p525_p3 = scmp.lt.u32.totalorder %s521_s10, %s865_s2 }
  0x2b   :  { %p527_p4 = pnand %p525_p3, %p522_p2 }
  0x2d   :  { %530 = shalt.err (!%p527_p4)
}
  0x2e   :  { %s531_s0 = scalar_lea.vmem %s47_s28, 512  ;;  %p536_p6 = scmp.lt.s32.totalorder %s47_s28, %s47_s28 }
  0x2f   :  { %p532_p5 = scmp.ne.s32.totalorder %s47_s28, %s531_s0  ;;  %p537_p7 = scmp.lt.s32.totalorder %s531_s0, %s531_s0 }
  0x31   :  { %p538_p8 = por %p537_p7, %p536_p6 }
  0x33   :  { %p539_p9 = pnand %p538_p8, %p532_p5 }
  0x35   :  { %542 = shalt.err (!%p539_p9)
}
  0x36   :  { %52 = dma.hbm_to_vmem [thread:$0]  %s865_s2, 512, %s47_s28, [#allocation6], %s667_s1, %s667_s1, %s668_s23  }
  0x37   :  { %s543_s18 = scalar_lea.hbm %s866_s3, 16 }
  0x38   :  { %p544_p10 = scmp.ne.s32.totalorder %s866_s3, %s543_s18  ;;  %p547_p11 = scmp.lt.u32.totalorder %s543_s18, %s866_s3 }
  0x3a   :  { %p549_p12 = pnand %p547_p11, %p544_p10 }
  0x3c   :  { %552 = shalt.err (!%p549_p12)
}
  0x3d   :  { %s553_s24 = scalar_lea.vmem %s60_s30, 16  ;;  %s557_s25 = scalar_lea.vmem %s60_s30, 32 }
  0x3e   :  { %p554_p13 = scmp.ne.s32.totalorder %s60_s30, %s553_s24  ;;  %p558_p0 = scmp.lt.s32.totalorder %s60_s30, %s60_s30 }
  0x3f   :  { %p559_p1 = scmp.lt.s32.totalorder %s557_s25, %s553_s24 }
  0x41   :  { %p560_p2 = por %p559_p1, %p558_p0 }
  0x43   :  { %p561_p3 = pnand %p560_p2, %p554_p13 }
  0x45   :  { %564 = shalt.err (!%p561_p3)
}
  0x46   :  { %62 = dma.hbm_to_vmem [thread:$0]  %s866_s3, 16, %s60_s30, [#allocation9]  }
  0x47   :  { %653 = dma.done.wait [#allocation3], 512  }
  0x48   :  { %654 = vsyncadd [#allocation3], 4294966784 }
  0x49   :  { %655 = dma.done.wait [#allocation6], 640  }
  0x4a   :  { %656 = vsyncadd [#allocation6], 4294966656 }
  0x4b   :  { %657 = dma.done.wait [#allocation9], 16  }
  0x4c   :  { %658 = vsyncadd [#allocation9], 4294967280  ;;  %vm80_vm0 = vcmask 64512   ;;  %v79_v0 = vld [vmem:[#allocation5] sm:$0xff]  ;;  %v76_v2 = vld [vmem:[#allocation2 + $0x8] sm:$0xff]  ;;  %s671_s28 = smov 32  }
  0x4d   :  { %v75_v1 = vld [vmem:[#allocation2] sm:$0xff]  ;;  %430 = vmatprep.subr.mxu0 %v79_v0  ;;  %v77_v3 = vld [vmem:[#allocation2 + $0x10] sm:$0xff]  ;;  %v412_v4 = vld [vmem:[#allocation8] ss:$0 sm:$0xff]  ;;  %vm207_vm1 = vcmask 261120   ;;  %s672_s3 = smov 96  }
  0x4e   :  { %432 = vmatprep.mubr.msk.f32.mxu0 %vm80_vm0, %v75_v1  ;;  %431 = vmatpush3.msra.mxu0 %v79_v0  ;;  %v216_v5 = vld [vmem:[#allocation7] sm:$0xff]  ;;  %v217_v6 = vld [vmem:[#allocation7 + $0x8] sm:$0xff]  ;;  %v218_v7 = vld [vmem:[#allocation7 + $0x10] sm:$0xff]  ;;  %s673_s29 = smov [#allocation11]   ;;  %s674_s8 = smov [#allocation10]  }
  0x4f   :  { %184 = vrot.lane.b32.xlu0 %v412_v4, %s671_s28  ;;  %433 = vmatmul.mubr.msk.f32.vlgmr.msra.gmra.mrb[0].mxu0 %vm80_vm0, %v76_v2  ;;  %v452_v8 = vpack.c.bf16 %v217_v6, %v216_v5  ;;  %v219_v9 = vld [vmem:[#allocation7 + $0x18] sm:$0xff]  ;;  %v78_v10 = vld [vmem:[#allocation2 + $0x18] sm:$0xff]  ;;  %s359_s30 = sshll.u32 %s673_s29, 4  ;;  %s347_s9 = sshll.u32 %s674_s8, 4  ;;  %s360_s30 = int_to_ptr.vmem [resolvable:$true] %s359_s30  ;;  %s348_s9 = int_to_ptr.vmem [resolvable:$true] %s347_s9 }
  0x50   :  { %435 = vmatprep.mubr.msk.f32.mxu0 %vm80_vm0, %v77_v3  ;;  %v456_v11 = vpack.c.bf16 %v219_v9, %v218_v7  ;;  %s565_s10 = scalar_lea.vmem %s360_s30, 512  ;;  %p570_p5 = scmp.lt.s32.totalorder %s360_s30, %s360_s30 }
  0x51   :  { %453 = vmatprep.subr.bf16.mxu0 %v452_v8  ;;  %460 = vmatprep.subr.bf16.mxu1 %v452_v8  ;;  %p566_p4 = scmp.ne.s32.totalorder %s360_s30, %s565_s10  ;;  %p571_p6 = scmp.lt.s32.totalorder %s565_s10, %s565_s10 }
  0x52   :  { %455 = vmatpush3.bf16.msra.mxu0 %v452_v8  ;;  %462 = vmatpush3.bf16.msra.mxu1 %v452_v8 }
  0x53   :  { %436 = vmatmul.mubr.msk.f32.gmra.mrb[2].mxu0 %vm80_vm0, %v78_v10  ;;  %457 = vmatprep.subr.bf16.mxu0 %v456_v11  ;;  %p572_p7 = por %p571_p6, %p570_p5 }
  0x54   :  { %461 = vmatprep.subr.bf16.mxu1 %v456_v11 }
  0x55   :  { %p573_p8 = pnand %p572_p7, %p566_p4 }
  0x56   :  { %459 = vmatpush3.bf16.msra.mxu0 %v456_v11  ;;  %463 = vmatpush3.bf16.msra.mxu1 %v456_v11 }
  0xc1   :  { %v185_v12 = vpop.permute.xlu0 %184 }
 0x122   :  { %v434_v13 = vpop.f32.mrb[0].mxu0 }
 0x123   :  { %213 = vst.msk [vmem:[#allocation10 + $0x8] sm:$0xff] %vm207_vm1, %v434_v13  ;;  %v159_v14 = vpop.f32.mrb[1].mxu0  ;;  %v188_v15 = vadd.f32 %v434_v13, %v185_v12 }
 0x124   :  { %v187_v16 = vadd.f32 %v185_v12, %v159_v14  ;;  %212 = vst.msk [vmem:[#allocation10] sm:$0xff] %vm207_vm1, %v159_v14  ;;  %446 = vmatprep.mubr.msk.f32.mxu0 %vm207_vm1, %v159_v14 }
 0x125   :  { %197 = vrot.lane.b32.xlu1 %v188_v15, %s672_s3  ;;  %447 = vmatmul.mubr.msk.f32.vlgmr.msra.gmra.mrb[4].mxu0 %vm207_vm1, %v434_v13 }
 0x126   :  { %195 = vrot.lane.b32.xlu0 %v187_v16, %s672_s3  ;;  %v437_v17 = vpop.f32.mrb[2].mxu0 }
 0x127   :  { %v190_v18 = vadd.f32 %v437_v17, %v185_v12  ;;  %215 = vst.msk [vmem:[#allocation10 + $0x18] sm:$0xff] %vm207_vm1, %v437_v17  ;;  %v169_v19 = vpop.f32.mrb[3].mxu0 }
 0x128   :  { %v189_v20 = vadd.f32 %v185_v12, %v169_v19  ;;  %214 = vst.msk [vmem:[#allocation10 + $0x10] sm:$0xff] %vm207_vm1, %v169_v19  ;;  %449 = vmatprep.mubr.msk.f32.mxu1 %vm207_vm1, %v169_v19 }
 0x129   :  { %450 = vmatmul.mubr.msk.f32.vlgmr.msra.gmra.mrb[0].mxu1 %vm207_vm1, %v437_v17 }
 0x12a   :  { %201 = vrot.lane.b32.xlu0 %v190_v18, %s672_s3  ;;  %199 = vrot.lane.b32.xlu1 %v189_v20, %s672_s3 }
 0x197   :  { %v198_v21 = vpop.permute.xlu1 %197 }
 0x198   :  { %209 = vst.msk [vmem:[#allocation11 + $0x8] sm:$0xff] %vm207_vm1, %v198_v21  ;;  %v196_v22 = vpop.permute.xlu0 %195 }
 0x199   :  { %208 = vst.msk [vmem:[#allocation11] sm:$0xff] %vm207_vm1, %v196_v22 }
 0x19c   :  { %v202_v23 = vpop.permute.xlu0 %201  ;;  %v200_v24 = vpop.permute.xlu1 %199 }
 0x19d   :  { %211 = vst.msk [vmem:[#allocation11 + $0x18] sm:$0xff] %vm207_vm1, %v202_v23  ;;  %210 = vst.msk [vmem:[#allocation11 + $0x10] sm:$0xff] %vm207_vm1, %v200_v24 }
 0x19e   :  { %576 = shalt.err (!%p573_p8)
}
 0x19f   :  { %s577_s13 = scalar_lea.hbm %s868_s5, 512 }
 0x1a0   :  { %p578_p9 = scmp.ne.s32.totalorder %s868_s5, %s577_s13  ;;  %p581_p10 = scmp.lt.u32.totalorder %s577_s13, %s868_s5 }
 0x1a2   :  { %p583_p11 = pnand %p581_p10, %p578_p9 }
 0x1a4   :  { %586 = shalt.err (!%p583_p11)
}
 0x1a5   :  { %365 = dma.vmem_to_hbm [thread:$0]  %s360_s30, 512, %s868_s5, [#allocation12], %s667_s1, %s667_s1, %s668_s23  }
 0x1a6   :  { %s587_s18 = scalar_lea.vmem %s348_s9, 512  ;;  %p592_p13 = scmp.lt.s32.totalorder %s348_s9, %s348_s9 }
 0x1a7   :  { %p588_p12 = scmp.ne.s32.totalorder %s348_s9, %s587_s18  ;;  %p593_p0 = scmp.lt.s32.totalorder %s587_s18, %s587_s18 }
 0x1a9   :  { %p594_p1 = por %p593_p0, %p592_p13 }
 0x1ab   :  { %p595_p2 = pnand %p594_p1, %p588_p12 }
 0x1ad   :  { %598 = shalt.err (!%p595_p2)
}
 0x1ae   :  { %s599_s21 = scalar_lea.hbm %s867_s4, 512 }
 0x1af   :  { %p600_p3 = scmp.ne.s32.totalorder %s867_s4, %s599_s21  ;;  %p603_p4 = scmp.lt.u32.totalorder %s599_s21, %s867_s4 }
 0x1b1   :  { %p605_p5 = pnand %p603_p4, %p600_p3 }
 0x1b3   :  { %608 = shalt.err (!%p605_p5)
}
 0x1b4   :  { %353 = dma.vmem_to_hbm [thread:$0]  %s348_s9, 512, %s867_s4, [#allocation4], %s667_s1, %s667_s1, %s668_s23   ;;  %vm317_vm2 = vcmask 31744  }
 0x1b5   :  { %s675_s28 = smov 124   ;;  %s676_s3 = smov [#allocation13]  }
 0x1b6   :  { %s371_s29 = sshll.u32 %s676_s3, 4  ;;  %s372_s29 = int_to_ptr.vmem [resolvable:$true] %s371_s29 }
 0x1b7   :  { %s609_s4 = scalar_lea.vmem %s372_s29, 512  ;;  %p614_p7 = scmp.lt.s32.totalorder %s372_s29, %s372_s29 }
 0x1b8   :  { %p610_p6 = scmp.ne.s32.totalorder %s372_s29, %s609_s4  ;;  %p615_p8 = scmp.lt.s32.totalorder %s609_s4, %s609_s4 }
 0x1ba   :  { %p616_p9 = por %p615_p8, %p614_p7 }
 0x1bc   :  { %p617_p10 = pnand %p616_p9, %p610_p6 }
 0x1f8   :  { %v448_v25 = vpop.f32.mrb[4].mxu0 }
 0x1f9   :  { %319 = vst.msk [vmem:[#allocation13 + $0x8] sm:$0xff] %vm317_vm2, %v448_v25  ;;  %328 = vrot.lane.b32.xlu0 %v448_v25, %s675_s28  ;;  %v298_v26 = vpop.f32.mrb[5].mxu0 }
 0x1fa   :  { %318 = vst.msk [vmem:[#allocation13] sm:$0xff] %vm317_vm2, %v298_v26  ;;  %326 = vrot.lane.b32.xlu1 %v298_v26, %s675_s28 }
 0x1fc   :  { %v451_v27 = vpop.f32.mrb[0].mxu1 }
 0x1fd   :  { %321 = vst.msk [vmem:[#allocation13 + $0x18] sm:$0xff] %vm317_vm2, %v451_v27  ;;  %v308_v28 = vpop.f32.mrb[1].mxu1  ;;  %332 = vrot.lane.b32.xlu0 %v451_v27, %s675_s28 }
 0x1fe   :  { %320 = vst.msk [vmem:[#allocation13 + $0x10] sm:$0xff] %vm317_vm2, %v308_v28  ;;  %330 = vrot.lane.b32.xlu1 %v308_v28, %s675_s28 }
 0x1ff   :  { %620 = shalt.err (!%p617_p10)
}
 0x200   :  { %s621_s9 = scalar_lea.hbm %s869_s6, 512 }
 0x201   :  { %p622_p11 = scmp.ne.s32.totalorder %s869_s6, %s621_s9  ;;  %p625_p12 = scmp.lt.u32.totalorder %s621_s9, %s869_s6 }
 0x203   :  { %p627_p13 = pnand %p625_p12, %p622_p11 }
 0x205   :  { %630 = shalt.err (!%p627_p13)
}
 0x206   :  { %377 = dma.vmem_to_hbm [thread:$0]  %s372_s29, 512, %s869_s6, [#allocation12], %s667_s1, %s667_s1, %s668_s23  }
 0x207   :  { %s677_s27 = smov [#allocation14]  }
 0x208   :  { %s383_s15 = sshll.u32 %s677_s27, 4  ;;  %s384_s15 = int_to_ptr.vmem [resolvable:$true] %s383_s15 }
 0x209   :  { %s631_s16 = scalar_lea.vmem %s384_s15, 512  ;;  %p636_p1 = scmp.lt.s32.totalorder %s384_s15, %s384_s15 }
 0x20a   :  { %p632_p0 = scmp.ne.s32.totalorder %s384_s15, %s631_s16  ;;  %p637_p2 = scmp.lt.s32.totalorder %s631_s16, %s631_s16 }
 0x20c   :  { %p638_p3 = por %p637_p2, %p636_p1 }
 0x20e   :  { %p639_p4 = pnand %p638_p3, %p632_p0 }
 0x26b   :  { %v329_v29 = vpop.permute.xlu0 %328 }
 0x26c   :  { %339 = vst.msk [vmem:[#allocation14 + $0x8] sm:$0xff] %vm317_vm2, %v329_v29  ;;  %v327_v30 = vpop.permute.xlu1 %326 }
 0x26d   :  { %338 = vst.msk [vmem:[#allocation14] sm:$0xff] %vm317_vm2, %v327_v30 }
 0x26f   :  { %v333_v31 = vpop.permute.xlu0 %332 }
 0x270   :  { %341 = vst.msk [vmem:[#allocation14 + $0x18] sm:$0xff] %vm317_vm2, %v333_v31  ;;  %v331_v32 = vpop.permute.xlu1 %330 }
 0x271   :  { %340 = vst.msk [vmem:[#allocation14 + $0x10] sm:$0xff] %vm317_vm2, %v331_v32 }
 0x272   :  { %642 = shalt.err (!%p639_p4)
}
 0x273   :  { %s643_s18 = scalar_lea.hbm %s870_s7, 512 }
 0x274   :  { %p644_p5 = scmp.ne.s32.totalorder %s870_s7, %s643_s18  ;;  %p647_p6 = scmp.lt.u32.totalorder %s643_s18, %s870_s7 }
 0x276   :  { %p649_p7 = pnand %p647_p6, %p644_p5 }
 0x278   :  { %652 = shalt.err (!%p649_p7)
}
 0x279   :  { %389 = dma.vmem_to_hbm [thread:$0]  %s384_s15, 512, %s870_s7, [#allocation15], %s667_s1, %s667_s1, %s668_s23  }
 0x27a   :  { %659 = dma.done.wait [#allocation4], 512  }
 0x27b   :  { %660 = vsyncadd [#allocation4], 4294966784 }
 0x27c   :  { %661 = dma.done.wait [#allocation12], 1024  }
 0x27d   :  { %662 = vsyncadd [#allocation12], 4294966272 }
 0x27e   :  { %663 = dma.done.wait [#allocation15], 512  }
 0x27f   :  { %664 = vsyncadd [#allocation15], 4294966784 }
 0x280   :  { %402 = vsyncpa [#allocation3], 1 }
 0x281   :  { %403 = vsyncpa [#allocation6], 1 }
 0x282   :  { %404 = vsyncpa [#allocation9], 1 }
 0x283   :  { %405 = vsyncpa [#allocation4], 1 }
 0x284   :  { %406 = vsyncpa [#allocation12], 1 }
 0x285   :  { %407 = vsyncpa [#allocation15], 1 }

</bundles_post_ra>
